<compile_context>
chip_gen: v7x
topology: tpu7x:2x2x1
jax: 0.10.0
libtpu: 0.0.40
codegen_flags: <defaults>
</compile_context>

<pallas_src>
import functools

import jax
import jax.numpy as jnp
from jax.experimental import pallas as pl
from jax.experimental.pallas import tpu as pltpu

_LANE = 128
_SUB = 8


def _dropout_kernel(x_ref, bits_ref, o_ref, *, threshold_bits: int, scale: float):
    # keep with probability (1 - p): P(bits >= round(p * 2^32)) = 1 - p
    keep = bits_ref[...] >= jnp.uint32(threshold_bits)
    x = x_ref[...]
    # Compute directly in x's dtype (no f32 round trip); integer-threshold mask
    # keeps the VPU work to one compare + one select + one multiply per vreg.
    scale_c = jnp.asarray(scale, dtype=x_ref.dtype)
    zero_c = jnp.zeros((), dtype=x_ref.dtype)
    o_ref[...] = jnp.where(keep, x * scale_c, zero_c)


def _choose_width(n: int):
    """Pick the widest lane dim (multiple of 128) so n divides exactly when possible."""
    for cand in (4096, 2048, 1024, 512, 256, 128):
        if n % (_SUB * cand) == 0:
            return cand, n  # exact: no pad / no post-slice copy
    w = 1024 if n >= _SUB * 1024 else _LANE
    padded = pl.cdiv(n, _SUB * w) * (_SUB * w)
    return w, padded


def dropout_pallas(x: jax.Array, seed: int, p: float = 0.5,
                   threshold: float = 0.9, training: bool = True) -> jax.Array:
    # TODO(synk): the PyTorch forward() is an empty stub; `threshold` has no
    # defined semantics there, so it is accepted but unused.
    del threshold
    if not training or p == 0.0:
        return x
    if p >= 1.0:
        return jnp.zeros_like(x)

    orig_shape = x.shape
    n = x.size

    W, padded = _choose_width(n)
    rows = padded // W

    x_flat = jnp.ravel(x)
    if padded != n:
        # Only taken when no exact lane-dense factorization exists; for the
        # shapes used here the exact path is hit and no pad/slice copy occurs.
        x_flat = jnp.pad(x_flat, (0, padded - n))
    x2d = x_flat.reshape(rows, W)

    # Uniform uint32 bits, one word per element (independent across all tiles).
    bits = jax.random.bits(jax.random.PRNGKey(seed), (rows, W), dtype=jnp.uint32)

    # Row-tile size: ~2 MiB of f32 per buffer so in+out double-buffering stays
    # well under the scoped-VMEM defaults (16 MiB v5e, 32 MiB v6e/v7x).
    target_rows = max(_SUB, (1 << 19) // W)          # ~512K elements per tile
    tr = min(rows, target_rows)
    tr = max(_SUB, (tr // _SUB) * _SUB)
    while rows % tr != 0:                            # keep tiles exact (rows is a multiple of 8)
        tr -= _SUB
    num_tiles = pl.cdiv(rows, tr)

    threshold_bits = min(int(round(p * 4294967296.0)), 4294967295)
    scale = 1.0 / (1.0 - p)
    kernel = functools.partial(_dropout_kernel,
                               threshold_bits=threshold_bits, scale=scale)

    out2d = pl.pallas_call(
        kernel,
        out_shape=jax.ShapeDtypeStruct((rows, W), x.dtype),
        grid=(num_tiles,),
        in_specs=[
            pl.BlockSpec((tr, W), lambda i: (i, 0)),   # x tile
            pl.BlockSpec((tr, W), lambda i: (i, 0)),   # random-bits tile
        ],
        out_specs=pl.BlockSpec((tr, W), lambda i: (i, 0)),
        input_output_aliases={0: 0},                   # overwrite the x slab in place
        compiler_params=pltpu.CompilerParams(
            dimension_semantics=("parallel",),         # megacore-shardable on v7x
        ),
    )(x2d, bits)

    out_flat = out2d.reshape(-1)
    if padded != n:
        out_flat = out_flat[:n]
    return out_flat.reshape(orig_shape)


if __name__ == "__main__":
    import numpy as np

    key = jax.random.PRNGKey(0)
    x = jax.random.normal(key, (2, 4, 16, 16), dtype=jnp.float32)

    p = 0.5
    y = dropout_pallas(x, seed=1234, p=p, threshold=0.9, training=True)
    y = jax.block_until_ready(y)

    # sanity checks: shape/dtype preserved; surviving elements equal x / (1 - p)
    assert y.shape == x.shape and y.dtype == x.dtype
    y_np = np.asarray(y)
    x_np = np.asarray(x)
    kept = y_np != 0.0
    np.testing.assert_allclose(y_np[kept], x_np[kept] / (1.0 - p),
                               rtol=1e-6, atol=1e-6)
    keep_frac = float(kept.mean())
    assert 0.25 < keep_frac < 0.75  # roughly (1 - p) of elements kept

    # eval / p=0 passthrough
    y_eval = jax.block_until_ready(dropout_pallas(x, seed=1, p=p, training=False))
    np.testing.assert_array_equal(np.asarray(y_eval), x_np)

    print("KERNEL_OK")
</pallas_src>

<mosaic_0001>
module attributes {stable_mosaic.version = 11 : i64} {
  func.func @_dropout_kernel(%arg0: i32, %arg1: memref<8x256xf32, #tpu.memory_space<vmem>>, %arg2: memref<8x256xi32, #tpu.memory_space<vmem>>, %arg3: memref<8x256xf32, #tpu.memory_space<vmem>>) attributes {dimension_semantics = [#tpu.dimension_semantics<parallel>], iteration_bounds = array<i64: 1>, scalar_prefetch = 0 : i64, scratch_operands = 0 : i64, tpu.core_type = #tpu.core_type<tc>, window_params = [{transform_indices = @transform_0, window_bounds = array<i64: 8, 256>}, {transform_indices = @transform_1, window_bounds = array<i64: 8, 256>}, {transform_indices = @transform_2, window_bounds = array<i64: 8, 256>}]} {
    %c0 = arith.constant 0 : index
    %c0_0 = arith.constant 0 : index
    %0 = vector.load %arg2[%c0, %c0_0] : memref<8x256xi32, #tpu.memory_space<vmem>>, vector<8x256xi32>
    %c-2147483648_i32 = arith.constant -2147483648 : i32
    %1 = vector.broadcast %c-2147483648_i32 : i32 to vector<8x256xi32>
    %2 = arith.cmpi uge, %0, %1 : vector<8x256xi32>
    %c0_1 = arith.constant 0 : index
    %c0_2 = arith.constant 0 : index
    %3 = vector.load %arg1[%c0_1, %c0_2] : memref<8x256xf32, #tpu.memory_space<vmem>>, vector<8x256xf32>
    %cst = arith.constant 2.000000e+00 : f32
    %4 = vector.broadcast %cst : f32 to vector<8x256xf32>
    %5 = arith.mulf %3, %4 : vector<8x256xf32>
    %cst_3 = arith.constant 0.000000e+00 : f32
    %6 = vector.broadcast %cst_3 : f32 to vector<8x256xf32>
    %7 = arith.select %2, %5, %6 : vector<8x256xi1>, vector<8x256xf32>
    %c0_4 = arith.constant 0 : index
    %c0_5 = arith.constant 0 : index
    %8 = vector.load %arg3[%c0_4, %c0_5] : memref<8x256xf32, #tpu.memory_space<vmem>>, vector<8x256xf32>
    tpu.vector_store %arg3[%c0_4, %c0_5], %7 {strides = array<i32>} : memref<8x256xf32, #tpu.memory_space<vmem>>, vector<8x256xf32>,
    return
  }
  func.func @transform_0(%arg0: i32) -> (i32, i32) {
    %c0_i32 = arith.constant 0 : i32
    %c0_i32_0 = arith.constant 0 : i32
    return %arg0, %c0_i32 : i32, i32
  }
  func.func @transform_1(%arg0: i32) -> (i32, i32) {
    %c0_i32 = arith.constant 0 : i32
    %c0_i32_0 = arith.constant 0 : i32
    return %arg0, %c0_i32 : i32, i32
  }
  func.func @transform_2(%arg0: i32) -> (i32, i32) {
    %c0_i32 = arith.constant 0 : i32
    %c0_i32_0 = arith.constant 0 : i32
    return %arg0, %c0_i32 : i32, i32
  }
}

</mosaic_0001>

<bundles_post_ra>
// kernel: tpu_custom_call.1
= control target key start
LH: loop header
LB: loop body
LE: loop exit
PB: predicated region body
PF: predicated region fallthrough
CT: control target
= control target key end

     0   :  { %7 = vsyncpa [#allocation3], 0  ;;  %s148_s0 = inlined_call_operand.hbm [shape: f32[8,256], index: 0, kind: input, shape index: {}, may-alias: {0,2}]   ;;  %s149_s1 = inlined_call_operand.vmem [shape: u32[8,256], index: 1, kind: input, shape index: {}]   ;;  %s150_s2 = inlined_call_operand.hbm [shape: f32[8,256], index: 2, kind: output, shape index: {}, may-alias: {0,2}]  }
   0x1   :  { %8 = vsyncpa [#allocation4], 0  ;;  %s101_s9 = smov [#allocation2]   ;;  %s53_s13 = scalar_lea.hbm %s148_s0, 256 }
   0x2   :  { %s15_s10 = sshll.u32 %s101_s9, 4  ;;  %p54_p0 = scmp.ne.s32.totalorder %s148_s0, %s53_s13  ;;  %s16_s10 = int_to_ptr.vmem [resolvable:$true] %s15_s10 }
   0x3   :  { %p57_p1 = scmp.lt.u32.totalorder %s53_s13, %s148_s0 }
   0x5   :  { %p59_p2 = pnand %p57_p1, %p54_p0 }
   0x7   :  { %62 = shalt.err (!%p59_p2)
}
   0x8   :  { %s63_s18 = scalar_lea.vmem %s16_s10, 256  ;;  %p68_p4 = scmp.lt.s32.totalorder %s16_s10, %s16_s10 }
   0x9   :  { %p64_p3 = scmp.ne.s32.totalorder %s16_s10, %s63_s18  ;;  %p69_p5 = scmp.lt.s32.totalorder %s63_s18, %s63_s18 }
   0xb   :  { %p70_p6 = por %p69_p5, %p68_p4 }
   0xd   :  { %p71_p7 = pnand %p70_p6, %p64_p3 }
   0xf   :  { %74 = shalt.err (!%p71_p7)
}
  0x10   :  { %18 = dma.hbm_to_vmem [thread:$0]  %s148_s0, 256, %s16_s10, [#allocation3]  }
  0x11   :  { %97 = dma.done.wait [#allocation3], 256  }
  0x12   :  { %98 = vsyncadd [#allocation3], 4294967040  ;;  %v24_v0 = vld [vmem:[%s149_s1] sm:$0xff]  ;;  %v25_v2 = vld [vmem:[%s149_s1 + $0x8] sm:$0xff]  ;;  %s102_s25 = smov [#allocation5]  }
  0x13   :  { %v28_v1 = vld [vmem:[#allocation2] sm:$0xff]  ;;  %s42_s26 = sshll.u32 %s102_s25, 4  ;;  %vm26_vm0 = vcmp.ge.u32.totalorder %v24_v0, 2147483648  ;;  %vm27_vm1 = vcmp.ge.u32.totalorder %v25_v2, 2147483648  ;;  %v29_v4 = vld [vmem:[#allocation2 + $0x8] sm:$0xff]  ;;  %s43_s26 = int_to_ptr.vmem [resolvable:$true] %s42_s26 }
  0x14   :  { %v30_v3 = vmul.f32 2.0, %v28_v1  ;;  %v31_v5 = vmul.f32 2.0, %v29_v4  ;;  %s75_s0 = scalar_lea.vmem %s43_s26, 256  ;;  %p80_p9 = scmp.lt.s32.totalorder %s43_s26, %s43_s26 }
  0x15   :  { %p76_p8 = scmp.ne.s32.totalorder %s43_s26, %s75_s0  ;;  %p81_p10 = scmp.lt.s32.totalorder %s75_s0, %s75_s0 }
  0x16   :  { %v32_v6 = vsel %vm26_vm0, %v30_v3, 0.0  ;;  %v33_v7 = vsel %vm27_vm1, %v31_v5, 0.0 }
  0x17   :  { %34 = vst [vmem:[#allocation5] sm:$0xff] %v32_v6  ;;  %35 = vst [vmem:[#allocation5 + $0x8] sm:$0xff] %v33_v7  ;;  %p82_p11 = por %p81_p10, %p80_p9 }
  0x19   :  { %p83_p12 = pnand %p82_p11, %p76_p8 }
  0x1b   :  { %86 = shalt.err (!%p83_p12)
}
  0x1c   :  { %s87_s28 = scalar_lea.hbm %s150_s2, 256 }
  0x1d   :  { %p88_p13 = scmp.ne.s32.totalorder %s150_s2, %s87_s28  ;;  %p91_p0 = scmp.lt.u32.totalorder %s87_s28, %s150_s2 }
  0x1f   :  { %p93_p1 = pnand %p91_p0, %p88_p13 }
  0x21   :  { %96 = shalt.err (!%p93_p1)
}
  0x22   :  { %45 = dma.vmem_to_hbm [thread:$0]  %s43_s26, 256, %s150_s2, [#allocation4]  }
  0x23   :  { %99 = dma.done.wait [#allocation4], 256  }
  0x24   :  { %100 = vsyncadd [#allocation4], 4294967040 }
  0x25   :  { %49 = vsyncpa [#allocation3], 1 }
  0x26   :  { %50 = vsyncpa [#allocation4], 1 }

</bundles_post_ra>
